<compile_context>
chip_gen: v5e
topology: v5e:2x2
jax: 0.10.0
libtpu: 0.0.40
codegen_flags: <defaults>
</compile_context>

<pallas_src>
import functools
import numpy as np
import jax
import jax.numpy as jnp
from jax.experimental import pallas as pl
from jax.experimental.pallas import tpu as pltpu

VMEM_LIMIT = 48 * 1024 * 1024   # <= v7x 64 MiB physical; fine on v5e/v6e too


def _round_up(a, b):
    return ((a + b - 1) // b) * b


# ---------------------------------------------------------------------------
# Pass 1 kernel: one fused projection matmul + leaky-relu, tiled over E ("parallel").
#   slab = [xd|xs] @ W  where W columns = [ Wv (from xs) | channel-replicated alpha ].
# Outputs: xv [E,HC] bf16, alpha_rep [E,HC] f32, per-tile maxima [(n_e*8),HC] f32.
# ---------------------------------------------------------------------------
def _proj_alpha_kernel(xds_ref, w_ref, xv_ref, a_ref, tmax_ref, *, HC, negative_slope):
    slab = jnp.dot(xds_ref[...], w_ref[...],
                   preferred_element_type=jnp.float32)        # [tE, 2*HC] f32
    xv = slab[:, :HC]
    a = slab[:, HC:]
    a = jnp.where(a > 0, a, negative_slope * a)               # leaky_relu (f32)
    xv_ref[...] = xv.astype(xv_ref.dtype)                     # bf16
    a_ref[...] = a                                            # f32, channel-replicated
    tmax_ref[...] = jnp.broadcast_to(jnp.max(a, axis=0, keepdims=True), tmax_ref.shape)


# ---------------------------------------------------------------------------
# Pass 2 kernel: segment softmax + weighted scatter-add.
# Grid = (N-blocks "parallel", E-blocks "arbitrary").  Single fused matmul per E-step
# accumulates numerator AND denominator into one f32 VMEM scratch of width 2*HC.
# ---------------------------------------------------------------------------
def _aggregate_kernel(s_ref, xv_ref, a_ref, m_ref, bias_ref, out_ref, acc_ref, *, HC):
    eb = pl.program_id(1)

    @pl.when(eb == 0)
    def _():
        acc_ref[...] = jnp.zeros_like(acc_ref)

    p = jnp.exp(a_ref[...] - m_ref[...])                       # [tE, HC] f32 (replicated/head)
    msg = (xv_ref[...].astype(jnp.float32) * p).astype(jnp.bfloat16)
    fused = jnp.concatenate([msg, p.astype(jnp.bfloat16)], axis=1)   # [tE, 2*HC] bf16
    acc_ref[...] += jnp.dot(s_ref[...], fused,
                            preferred_element_type=jnp.float32)      # [tN, 2*HC] f32

    @pl.when(eb == pl.num_programs(1) - 1)
    def _():
        acc = acc_ref[...]
        inv = pl.reciprocal(acc[:, HC:] + 1e-16, approx=True)        # EUP, ~free
        out_ref[...] = (acc[:, :HC] * inv + bias_ref[...]).astype(out_ref.dtype)
    # TODO(synk): F.dropout on attention weights skipped (dropout=0.0 / inference).


# ---------------------------------------------------------------------------
# Host/JAX glue + pallas_call wrappers
# ---------------------------------------------------------------------------
def _preprocess_graph(edge_index, edge_type, num_nodes, edge_type_self):
    ei = np.asarray(edge_index)
    et = np.asarray(edge_type)
    mask = ei[0] != ei[1]
    ei = ei[:, mask]
    et = et[mask]
    loops = np.arange(num_nodes, dtype=ei.dtype)
    src = np.concatenate([ei[0], loops])
    dst = np.concatenate([ei[1], loops])
    et_full = np.concatenate([et, np.full((num_nodes,), edge_type_self, dtype=et.dtype)])
    return src, dst, et_full


def het_emb_conv_forward(params, H, C, x, edge_index, node_type, edge_type,
                         edge_type_self=0, negative_slope=0.2,
                         tile_e=1024, max_tile_n=256):
    # For v5e prefer max_tile_n=128 (4x128x128 MXU); 256 targets v6e/v7x 256-row MXU.
    x = jnp.asarray(x, jnp.float32)
    N, D = x.shape
    HC = H * C

    src, dst, et_full = _preprocess_graph(edge_index, edge_type, N, edge_type_self)
    E = src.shape[0]

    # --- tile / padding choices ((8,128)-aligned; tile_e multiple of 256) ---
    tile_e = min(tile_e, _round_up(E, 256))
    E_pad = _round_up(E, tile_e)
    tile_n = min(max_tile_n, _round_up(N, 8))
    N_pad = _round_up(N, tile_n)
    n_e = E_pad // tile_e
    n_n = N_pad // tile_n

    # Dense one-hot scatter matrix: S[i, e] = 1 iff dst[e] == i (padded rows/cols zero).
    # TODO(synk): for large sparse graphs replace dense S with dst-sorted edges +
    # PrefetchScalarGridSpec per-node segment offsets (O(E) instead of O(N*E)).
    S_np = np.zeros((N_pad, E_pad), np.float32)
    S_np[dst, np.arange(E)] = 1.0
    S = jnp.asarray(S_np).astype(jnp.bfloat16)

    # --- embedding lookups and per-edge gathers (glue) ---
    xn = x + params['node_emb'][jnp.asarray(node_type)]
    xs = xn[jnp.asarray(src)] + params['edge_emb'][jnp.asarray(et_full)]
    xd = xn[jnp.asarray(dst)]
    xds = jnp.concatenate([xd, xs], axis=1)                             # [E, 2D]
    xds_p = jnp.pad(xds, ((0, E_pad - E), (0, 0))).astype(jnp.bfloat16)

    # --- fold att_i/att_j into the projection weights (host, f32) ---
    wq_a = (params['wq'].reshape(D, H, C) * params['att_i'][None]).sum(-1)  # [D, H]
    wk_a = (params['wk'].reshape(D, H, C) * params['att_j'][None]).sum(-1)  # [D, H]
    wq_a_rep = jnp.repeat(wq_a, C, axis=1)                                  # [D, HC]
    wk_a_rep = jnp.repeat(wk_a, C, axis=1)                                  # [D, HC]
    W = jnp.concatenate(
        [jnp.concatenate([jnp.zeros((D, HC), jnp.float32), wq_a_rep], axis=1),  # xd rows
         jnp.concatenate([params['wv'], wk_a_rep], axis=1)],                    # xs rows
        axis=0).astype(jnp.bfloat16)                                            # [2D, 2HC]

    bias = params['bias'].reshape(1, HC).astype(jnp.float32)

    # ---- pass 1: fused projection + alpha (channel-replicated) + per-tile maxima ----
    xv, alpha, tmax = pl.pallas_call(
        functools.partial(_proj_alpha_kernel, HC=HC, negative_slope=negative_slope),
        grid=(n_e,),
        in_specs=[
            pl.BlockSpec((tile_e, 2 * D), lambda e: (e, 0)),
            pl.BlockSpec((2 * D, 2 * HC), lambda e: (0, 0)),
        ],
        out_specs=[
            pl.BlockSpec((tile_e, HC), lambda e: (e, 0)),
            pl.BlockSpec((tile_e, HC), lambda e: (e, 0)),
            pl.BlockSpec((8, HC), lambda e: (e, 0)),
        ],
        out_shape=[
            jax.ShapeDtypeStruct((E_pad, HC), jnp.bfloat16),
            jax.ShapeDtypeStruct((E_pad, HC), jnp.float32),
            jax.ShapeDtypeStruct((n_e * 8, HC), jnp.float32),
        ],
        compiler_params=pltpu.CompilerParams(
            dimension_semantics=("parallel",),
            vmem_limit_bytes=VMEM_LIMIT),
    )(xds_p, W)

    # Tiny global reduce of per-tile maxima (softmax is shift-invariant per segment,
    # so a single global per-head shift is valid).
    m = jnp.max(tmax, axis=0, keepdims=True)                              # [1, HC] f32

    # ---- pass 2: segment softmax + scatter-add aggregation (fused num|den matmul) ----
    out_pad = pl.pallas_call(
        functools.partial(_aggregate_kernel, HC=HC),
        grid=(n_n, n_e),
        in_specs=[
            pl.BlockSpec((tile_n, tile_e), lambda n, e: (n, e)),
            pl.BlockSpec((tile_e, HC), lambda n, e: (e, 0)),
            pl.BlockSpec((tile_e, HC), lambda n, e: (e, 0)),
            pl.BlockSpec((1, HC), lambda n, e: (0, 0)),
            pl.BlockSpec((1, HC), lambda n, e: (0, 0)),
        ],
        out_specs=pl.BlockSpec((tile_n, HC), lambda n, e: (n, 0)),
        out_shape=jax.ShapeDtypeStruct((N_pad, HC), jnp.float32),
        scratch_shapes=[pltpu.VMEM((tile_n, 2 * HC), jnp.float32)],
        compiler_params=pltpu.CompilerParams(
            dimension_semantics=("parallel", "arbitrary"),
            vmem_limit_bytes=VMEM_LIMIT),
    )(S, xv, alpha, m, bias)

    return out_pad[:N]


# ---------------------------------------------------------------------------
# Parameter init + pure-JAX f32 reference (for tolerance check)
# ---------------------------------------------------------------------------
def glorot(key, shape):
    fan_in, fan_out = shape[-2], shape[-1]
    limit = np.sqrt(6.0 / (fan_in + fan_out))
    return jax.random.uniform(key, shape, jnp.float32, -limit, limit)


def init_params(key, in_hid, out_hid, n_heads, num_node_type, num_edge_type):
    C = out_hid // n_heads
    H = n_heads
    ks = jax.random.split(key, 7)
    params = dict(
        wq=glorot(ks[0], (in_hid, H * C)),        # lin_q.weight.T
        wk=glorot(ks[1], (in_hid, H * C)),        # lin_k.weight.T
        wv=glorot(ks[2], (in_hid, H * C)),        # lin_v.weight.T
        att_i=glorot(ks[3], (H, C)),
        att_j=glorot(ks[4], (H, C)),
        bias=jnp.zeros((1, H * C), jnp.float32),  # zeros() init, concat=True
        node_emb=jax.random.normal(ks[5], (num_node_type, in_hid), jnp.float32),
        edge_emb=jax.random.normal(ks[6], (num_edge_type, in_hid), jnp.float32),
    )
    return params, H, C


def ref_forward(params, H, C, x, node_type, src, dst, et_full, negative_slope=0.2):
    N, D = x.shape
    HC = H * C
    xn = jnp.asarray(x, jnp.float32) + params['node_emb'][jnp.asarray(node_type)]
    xs = xn[jnp.asarray(src)] + params['edge_emb'][jnp.asarray(et_full)]
    xd = xn[jnp.asarray(dst)]
    xq = xd @ params['wq']
    xk = xs @ params['wk']
    xv = xs @ params['wv']
    ai = params['att_i'].reshape(1, HC)
    aj = params['att_j'].reshape(1, HC)
    t = xq * ai + xk * aj
    alpha = jnp.stack([t[:, h * C:(h + 1) * C].sum(-1) for h in range(H)], axis=1)
    alpha = jnp.where(alpha > 0, alpha, negative_slope * alpha)
    dj = jnp.asarray(dst)
    m = jnp.full((N, H), -jnp.inf, jnp.float32).at[dj].max(alpha)
    p = jnp.exp(alpha - m[dj])
    den = jnp.zeros((N, H), jnp.float32).at[dj].add(p)
    a = p / (den[dj] + 1e-16)
    msg = xv * jnp.repeat(a, C, axis=1)
    out = jnp.zeros((N, HC), jnp.float32).at[dj].add(msg)
    return out + params['bias']


if __name__ == "__main__":
    # GeneralConv('het-emb', in_hid=32, out_hid=32, n_heads=2, dropout=0.0,
    #             num_node_type=3, num_edge_type=4, edge_index_ts=None)
    N, in_hid, out_hid, n_heads = 16, 32, 32, 2
    num_node_type, num_edge_type = 3, 4
    E0 = 300

    key = jax.random.PRNGKey(0)
    k_par, k_x, k_ei, k_nt, k_et = jax.random.split(key, 5)

    params, H, C = init_params(k_par, in_hid, out_hid, n_heads,
                               num_node_type, num_edge_type)

    x = jax.random.normal(k_x, (N, in_hid), jnp.float32)
    edge_index = np.asarray(jax.random.randint(k_ei, (2, E0), 0, N), dtype=np.int32)
    node_type = np.asarray(jax.random.randint(k_nt, (N,), 0, num_node_type), dtype=np.int32)
    edge_type = np.asarray(jax.random.randint(k_et, (E0,), 0, num_edge_type), dtype=np.int32)

    out = het_emb_conv_forward(params, H, C, x, edge_index, node_type, edge_type)
    out = jax.block_until_ready(out)
    assert out.shape == (N, out_hid) and out.dtype == jnp.float32

    # pure-JAX f32 reference check (bf16 kernel -> loose tolerance)
    src, dst, et_full = _preprocess_graph(edge_index, edge_type, N, 0)
    ref = jax.block_until_ready(ref_forward(params, H, C, x, node_type, src, dst, et_full))
    rel = float(jnp.linalg.norm(out - ref) / (jnp.linalg.norm(ref) + 1e-12))
    assert rel < 0.1, f"relative error too large: {rel}"
    print("KERNEL_OK")
</pallas_src>

<mosaic_0001>
module attributes {stable_mosaic.version = 11 : i64} {
  func.func @_proj_alpha_kernel(%arg0: i32, %arg1: memref<512x64xbf16, #tpu.memory_space<vmem>>, %arg2: memref<64x64xbf16, #tpu.memory_space<vmem>>, %arg3: memref<512x32xbf16, #tpu.memory_space<vmem>>, %arg4: memref<512x32xf32, #tpu.memory_space<vmem>>, %arg5: memref<8x32xf32, #tpu.memory_space<vmem>>) attributes {dimension_semantics = [#tpu.dimension_semantics<parallel>], iteration_bounds = array<i64: 1>, scalar_prefetch = 0 : i64, scratch_operands = 0 : i64, tpu.core_type = #tpu.core_type<tc>, window_params = [{transform_indices = @transform_0, window_bounds = array<i64: 512, 64>}, {pipeline_mode = #tpu.pipeline_mode<synchronous>, transform_indices = @transform_1, window_bounds = array<i64: 64, 64>}, {transform_indices = @transform_2, window_bounds = array<i64: 512, 32>}, {transform_indices = @transform_3, window_bounds = array<i64: 512, 32>}, {transform_indices = @transform_4, window_bounds = array<i64: 8, 32>}]} {
    %c0 = arith.constant 0 : index
    %c0_0 = arith.constant 0 : index
    %0 = vector.load %arg1[%c0, %c0_0] : memref<512x64xbf16, #tpu.memory_space<vmem>>, vector<512x64xbf16>
    %c0_1 = arith.constant 0 : index
    %c0_2 = arith.constant 0 : index
    %1 = vector.load %arg2[%c0_1, %c0_2] : memref<64x64xbf16, #tpu.memory_space<vmem>>, vector<64x64xbf16>
    %cst = arith.constant dense<0.000000e+00> : vector<512x64xf32>
    %2 = tpu.matmul %0, %1, %cst {dimension_numbers = #tpu.dot_dimension_numbers<[1], [0], [0], [1], [0, 0, 1, 1], [], []>} : vector<512x64xbf16>, vector<64x64xbf16>, vector<512x64xf32> -> vector<512x64xf32>
    %3 = vector.extract_strided_slice %2 {offsets = [0, 0], sizes = [512, 32], strides = [1, 1]} : vector<512x64xf32> to vector<512x32xf32>
    %4 = vector.extract_strided_slice %2 {offsets = [0, 32], sizes = [512, 32], strides = [1, 1]} : vector<512x64xf32> to vector<512x32xf32>
    %cst_3 = arith.constant 0.000000e+00 : f32
    %5 = vector.broadcast %cst_3 : f32 to vector<512x32xf32>
    %6 = arith.cmpf ogt, %4, %5 : vector<512x32xf32>
    %cst_4 = arith.constant 2.000000e-01 : f32
    %7 = vector.broadcast %cst_4 : f32 to vector<512x32xf32>
    %8 = arith.mulf %7, %4 : vector<512x32xf32>
    %9 = arith.select %6, %4, %8 : vector<512x32xi1>, vector<512x32xf32>
    %10 = arith.truncf %3 : vector<512x32xf32> to vector<512x32xbf16>
    %c0_5 = arith.constant 0 : index
    %c0_6 = arith.constant 0 : index
    %11 = vector.load %arg3[%c0_5, %c0_6] : memref<512x32xbf16, #tpu.memory_space<vmem>>, vector<512x32xbf16>
    tpu.vector_store %arg3[%c0_5, %c0_6], %10 {strides = array<i32>} : memref<512x32xbf16, #tpu.memory_space<vmem>>, vector<512x32xbf16>,
    %c0_7 = arith.constant 0 : index
    %c0_8 = arith.constant 0 : index
    %12 = vector.load %arg4[%c0_7, %c0_8] : memref<512x32xf32, #tpu.memory_space<vmem>>, vector<512x32xf32>
    tpu.vector_store %arg4[%c0_7, %c0_8], %9 {strides = array<i32>} : memref<512x32xf32, #tpu.memory_space<vmem>>, vector<512x32xf32>,
    %cst_9 = arith.constant dense<0xFF800000> : vector<32xf32>
    %13 = vector.multi_reduction <maximumf>, %9, %cst_9 [0] : vector<512x32xf32> to vector<32xf32>
    %14 = vector.shape_cast %13 : vector<32xf32> to vector<1x32xf32>
    %15 = vector.shape_cast %14 : vector<1x32xf32> to vector<1x32xf32>
    %16 = vector.broadcast %15 : vector<1x32xf32> to vector<8x32xf32>
    %c0_10 = arith.constant 0 : index
    %c0_11 = arith.constant 0 : index
    %17 = vector.load %arg5[%c0_10, %c0_11] : memref<8x32xf32, #tpu.memory_space<vmem>>, vector<8x32xf32>
    tpu.vector_store %arg5[%c0_10, %c0_11], %16 {strides = array<i32>} : memref<8x32xf32, #tpu.memory_space<vmem>>, vector<8x32xf32>,
    return
  }
  func.func @transform_0(%arg0: i32) -> (i32, i32) {
    %c0_i32 = arith.constant 0 : i32
    %c0_i32_0 = arith.constant 0 : i32
    return %arg0, %c0_i32 : i32, i32
  }
  func.func @transform_1(%arg0: i32) -> (i32, i32) {
    %c0_i32 = arith.constant 0 : i32
    %c0_i32_0 = arith.constant 0 : i32
    %c0_i32_1 = arith.constant 0 : i32
    return %c0_i32, %c0_i32_0 : i32, i32
  }
  func.func @transform_2(%arg0: i32) -> (i32, i32) {
    %c0_i32 = arith.constant 0 : i32
    %c0_i32_0 = arith.constant 0 : i32
    return %arg0, %c0_i32 : i32, i32
  }
  func.func @transform_3(%arg0: i32) -> (i32, i32) {
    %c0_i32 = arith.constant 0 : i32
    %c0_i32_0 = arith.constant 0 : i32
    return %arg0, %c0_i32 : i32, i32
  }
  func.func @transform_4(%arg0: i32) -> (i32, i32) {
    %c0_i32 = arith.constant 0 : i32
    %c0_i32_0 = arith.constant 0 : i32
    return %arg0, %c0_i32 : i32, i32
  }
}

</mosaic_0001>

<bundles_post_ra>
// kernel: tpu_custom_call.1
= control target key start
LH: loop header
LB: loop body
LE: loop exit
PB: predicated region body
PF: predicated region fallthrough
CT: control target
= control target key end

     0   :  { %s2642_s0 = inlined_call_operand.vmem [shape: bf16[512,64], index: 0, kind: input, shape index: {}]   ;;  %s2643_s1 = inlined_call_operand.vmem [shape: bf16[64,64], index: 1, kind: input, shape index: {}]   ;;  %s2644_s2 = inlined_call_operand.vmem [shape: bf16[512,32], index: 2, kind: output, shape index: {0}]   ;;  %s2645_s3 = inlined_call_operand.vmem [shape: f32[512,32], index: 3, kind: output, shape index: {1}]   ;;  %s2646_s4 = inlined_call_operand.hbm [shape: f32[8,32], index: 4, kind: output, shape index: {2}]  }
   0x1   :  { %v1554_v0 = vld [vmem:[%s2643_s1 + $0x18] sm:$0xff]  ;;  %v1553_v1 = vld [vmem:[%s2643_s1 + $0x10] sm:$0xff] }
   0x2   :  { %373 = vmatpush.bf16.msra.mxu0 %v1554_v0  ;;  %1555 = vmatpush.bf16.msra.mxu1 %v1554_v0 }
   0x3   :  { %1556 = vmatpush.bf16.msra.mxu2 %v1554_v0  ;;  %1557 = vmatpush.bf16.msra.mxu3 %v1554_v0 }
   0x4   :  { %10 = vsyncpa [#allocation3], 0  ;;  %v1552_v2 = vld [vmem:[%s2643_s1 + $0x8] sm:$0xff]  ;;  %v1551_v3 = vld [vmem:[%s2643_s1] sm:$0xff]  ;;  %vm272_vm0 = vcmask 523264   ;;  %vm794_vm1 = vcmask 257024  }
   0x5   :  { %v1519_v4 = vld [vmem:[%s2642_s0] sm:$0xff]  ;;  %v1520_v8 = vld [vmem:[%s2642_s0 + $0x8] sm:$0xff]  ;;  %v1521_v12 = vld [vmem:[%s2642_s0 + $0x10] sm:$0xff]  ;;  %vm1180_vm4 = vcmask 523520   ;;  %s1595_s9 = smov 96   ;;  %s1596_s7 = smov [#allocation2]  }
   0x6   :  { %374 = vmatpush.bf16.msra.mxu0 %v1553_v1  ;;  %1558 = vmatpush.bf16.msra.mxu1 %v1553_v1  ;;  %v1527_v5 = vld [vmem:[%s2642_s0 + $0x40] sm:$0xff]  ;;  %v1528_v9 = vld [vmem:[%s2642_s0 + $0x48] sm:$0xff]  ;;  %v1529_v13 = vld [vmem:[%s2642_s0 + $0x50] sm:$0xff]  ;;  %s1328_s8 = sshll.u32 %s1596_s7, 4  ;;  %s1330_s12 = sshll.u32 %s2646_s4, 4  ;;  %s1329_s8 = int_to_ptr.vmem [resolvable:$true] %s1328_s8  ;;  %s1331_s12 = int_to_ptr.hbm [resolvable:$true] %s1330_s12 }
   0x7   :  { %1559 = vmatpush.bf16.msra.mxu2 %v1553_v1  ;;  %1560 = vmatpush.bf16.msra.mxu3 %v1553_v1  ;;  %v1535_v6 = vld [vmem:[%s2642_s0 + $0x80] sm:$0xff]  ;;  %v1536_v10 = vld [vmem:[%s2642_s0 + $0x88] sm:$0xff]  ;;  %v1537_v14 = vld [vmem:[%s2642_s0 + $0x90] sm:$0xff] }
   0x8   :  { %v1543_v7 = vld [vmem:[%s2642_s0 + $0xc0] sm:$0xff]  ;;  %v1544_v11 = vld [vmem:[%s2642_s0 + $0xc8] sm:$0xff]  ;;  %v1545_v15 = vld [vmem:[%s2642_s0 + $0xd0] sm:$0xff] }
   0x9   :  { %v1522_v16 = vld [vmem:[%s2642_s0 + $0x18] sm:$0xff]  ;;  %v1523_v20 = vld [vmem:[%s2642_s0 + $0x20] sm:$0xff]  ;;  %v1524_v24 = vld [vmem:[%s2642_s0 + $0x28] sm:$0xff] }
   0xa   :  { %375 = vmatpush.bf16.msra.mxu0 %v1552_v2  ;;  %1561 = vmatpush.bf16.msra.mxu1 %v1552_v2  ;;  %v1530_v17 = vld [vmem:[%s2642_s0 + $0x58] sm:$0xff]  ;;  %v1531_v21 = vld [vmem:[%s2642_s0 + $0x60] sm:$0xff]  ;;  %v1532_v25 = vld [vmem:[%s2642_s0 + $0x68] sm:$0xff] }
   0xb   :  { %1562 = vmatpush.bf16.msra.mxu2 %v1552_v2  ;;  %1563 = vmatpush.bf16.msra.mxu3 %v1552_v2  ;;  %v1538_v18 = vld [vmem:[%s2642_s0 + $0x98] sm:$0xff]  ;;  %v1539_v22 = vld [vmem:[%s2642_s0 + $0xa0] sm:$0xff]  ;;  %v1540_v26 = vld [vmem:[%s2642_s0 + $0xa8] sm:$0xff] }
   0xc   :  { %v1546_v19 = vld [vmem:[%s2642_s0 + $0xd8] sm:$0xff]  ;;  %v1547_v23 = vld [vmem:[%s2642_s0 + $0xe0] sm:$0xff]  ;;  %v1548_v27 = vld [vmem:[%s2642_s0 + $0xe8] sm:$0xff] }
   0xd   :  { %v1525_v28 = vld [vmem:[%s2642_s0 + $0x30] sm:$0xff]  ;;  %v1526_v32 = vld [vmem:[%s2642_s0 + $0x38] sm:$0xff] }
   0xe   :  { %376 = vmatpush.bf16.msra.mxu0 %v1551_v3  ;;  %1564 = vmatpush.bf16.msra.mxu1 %v1551_v3  ;;  %v1533_v29 = vld [vmem:[%s2642_s0 + $0x70] sm:$0xff]  ;;  %v1534_v33 = vld [vmem:[%s2642_s0 + $0x78] sm:$0xff] }
   0xf   :  { %1565 = vmatpush.bf16.msra.mxu2 %v1551_v3  ;;  %1566 = vmatpush.bf16.msra.mxu3 %v1551_v3  ;;  %v1541_v30 = vld [vmem:[%s2642_s0 + $0xb0] sm:$0xff]  ;;  %v1542_v34 = vld [vmem:[%s2642_s0 + $0xb8] sm:$0xff] }
  0x10   :  { %v1549_v31 = vld [vmem:[%s2642_s0 + $0xf0] sm:$0xff]  ;;  %v1550_v35 = vld [vmem:[%s2642_s0 + $0xf8] sm:$0xff] }
  0x11   :  { %1487 = vmatmul.msk.bf16.vlgmr.msra.gmra.mxu0 %vm272_vm0, %v1519_v4  ;;  %1495 = vmatmul.msk.bf16.vlgmr.msra.gmra.mxu1 %vm272_vm0, %v1527_v5 }
  0x12   :  { %1503 = vmatmul.msk.bf16.vlgmr.msra.gmra.mxu2 %vm272_vm0, %v1535_v6  ;;  %1511 = vmatmul.msk.bf16.vlgmr.msra.gmra.mxu3 %vm272_vm0, %v1543_v7 }
  0x21   :  { %1488 = vmatmul.msk.bf16.gmra.mxu0 %vm272_vm0, %v1520_v8  ;;  %1496 = vmatmul.msk.bf16.gmra.mxu1 %vm272_vm0, %v1528_v9 }
  0x22   :  { %1504 = vmatmul.msk.bf16.gmra.mxu2 %vm272_vm0, %v1536_v10  ;;  %1512 = vmatmul.msk.bf16.gmra.mxu3 %vm272_vm0, %v1544_v11 }
  0x31   :  { %1489 = vmatmul.msk.bf16.gmra.mxu0 %vm272_vm0, %v1521_v12  ;;  %1497 = vmatmul.msk.bf16.gmra.mxu1 %vm272_vm0, %v1529_v13 }
  0x32   :  { %1505 = vmatmul.msk.bf16.gmra.mxu2 %vm272_vm0, %v1537_v14  ;;  %1513 = vmatmul.msk.bf16.gmra.mxu3 %vm272_vm0, %v1545_v15 }
  0x41   :  { %1490 = vmatmul.msk.bf16.gmra.mxu0 %vm272_vm0, %v1522_v16  ;;  %1498 = vmatmul.msk.bf16.gmra.mxu1 %vm272_vm0, %v1530_v17 }
  0x42   :  { %1506 = vmatmul.msk.bf16.gmra.mxu2 %vm272_vm0, %v1538_v18  ;;  %1514 = vmatmul.msk.bf16.gmra.mxu3 %vm272_vm0, %v1546_v19 }
  0x51   :  { %1491 = vmatmul.msk.bf16.gmra.mxu0 %vm272_vm0, %v1523_v20  ;;  %1499 = vmatmul.msk.bf16.gmra.mxu1 %vm272_vm0, %v1531_v21 }
  0x52   :  { %1507 = vmatmul.msk.bf16.gmra.mxu2 %vm272_vm0, %v1539_v22  ;;  %1515 = vmatmul.msk.bf16.gmra.mxu3 %vm272_vm0, %v1547_v23 }
  0x61   :  { %1492 = vmatmul.msk.bf16.gmra.mxu0 %vm272_vm0, %v1524_v24  ;;  %1500 = vmatmul.msk.bf16.gmra.mxu1 %vm272_vm0, %v1532_v25 }
  0x62   :  { %1508 = vmatmul.msk.bf16.gmra.mxu2 %vm272_vm0, %v1540_v26  ;;  %1516 = vmatmul.msk.bf16.gmra.mxu3 %vm272_vm0, %v1548_v27 }
  0x71   :  { %1493 = vmatmul.msk.bf16.gmra.mxu0 %vm272_vm0, %v1525_v28  ;;  %1501 = vmatmul.msk.bf16.gmra.mxu1 %vm272_vm0, %v1533_v29 }
  0x72   :  { %1509 = vmatmul.msk.bf16.gmra.mxu2 %vm272_vm0, %v1541_v30  ;;  %1517 = vmatmul.msk.bf16.gmra.mxu3 %vm272_vm0, %v1549_v31 }
  0x81   :  { %1494 = vmatmul.msk.bf16.gmra.mxu0 %vm272_vm0, %v1526_v32  ;;  %1502 = vmatmul.msk.bf16.gmra.mxu1 %vm272_vm0, %v1534_v33 }
  0x82   :  { %1510 = vmatmul.msk.bf16.gmra.mxu2 %vm272_vm0, %v1542_v34  ;;  %1518 = vmatmul.msk.bf16.gmra.mxu3 %vm272_vm0, %v1550_v35 }
  0x8e   :  { %v378_v36 = vpop.f32.mrf.mxu0  ;;  %v418_v37 = vpop.f32.mrf.mxu1 }
  0x8f   :  { %v730_v38 = vpack.c.bf16 %v378_v36, %v378_v36  ;;  %v746_v39 = vpack.c.bf16 %v418_v37, %v418_v37  ;;  %vm538_vm2 = vcmp.gt.f32.partialorder %v378_v36, 0.0  ;;  %v602_v40 = vmul.f32 0.2, %v378_v36 }
  0x90   :  { %vm554_vm3 = vcmp.gt.f32.partialorder %v418_v37, 0.0  ;;  %v618_v41 = vmul.f32 0.2, %v418_v37 }
  0x91   :  { %795 = vst.msk [vmem:[%s2644_s2] sm:$0xf] %vm794_vm1, %v730_v38  ;;  %v666_v42 = vsel %vm538_vm2, %v378_v36, %v602_v40 }
  0x92   :  { %811 = vst.msk [vmem:[%s2644_s2 + $0x40] sm:$0xf] %vm794_vm1, %v746_v39  ;;  %923 = vrot.lane.b32.xlu0 %v666_v42, %s1595_s9  ;;  %v682_v43 = vsel %vm554_vm3, %v418_v37, %v618_v41  ;;  %v1181_v44 = vsel %vm1180_vm4, %v666_v42, -inf }
  0x93   :  { %955 = vrot.lane.b32.xlu1 %v682_v43, %s1595_s9  ;;  %v1209_v50 = vsel %vm1180_vm4, %v682_v43, -inf }
  0x94   :  { %v1186_v56 = vmax.f32 %v1181_v44, %v1209_v50 }
  0x95   :  { %v458_v45 = vpop.f32.mrf.mxu2  ;;  %v498_v46 = vpop.f32.mrf.mxu3 }
  0x96   :  { %v762_v47 = vpack.c.bf16 %v458_v45, %v458_v45  ;;  %v650_v48 = vmul.f32 0.2, %v498_v46  ;;  %v778_v49 = vpack.c.bf16 %v498_v46, %v498_v46  ;;  %v380_v51 = vpop.f32.mrf.mxu0  ;;  %v420_v52 = vpop.f32.mrf.mxu1  ;;  %vm570_vm5 = vcmp.gt.f32.partialorder %v458_v45, 0.0 }
  0x97   :  { %v731_v53 = vpack.c.bf16 %v380_v51, %v380_v51  ;;  %v747_v54 = vpack.c.bf16 %v420_v52, %v420_v52  ;;  %v634_v55 = vmul.f32 0.2, %v458_v45  ;;  %vm586_vm6 = vcmp.gt.f32.partialorder %v498_v46, 0.0 }
  0x98   :  { %827 = vst.msk [vmem:[%s2644_s2 + $0x80] sm:$0xf] %vm794_vm1, %v762_v47  ;;  %v714_v57 = vsel %vm586_vm6, %v498_v46, %v650_v48  ;;  %v603_v60 = vmul.f32 0.2, %v380_v51  ;;  %v619_v61 = vmul.f32 0.2, %v420_v52 }
  0x99   :  { %843 = vst.msk [vmem:[%s2644_s2 + $0xc0] sm:$0xf] %vm794_vm1, %v778_v49  ;;  %v698_v58 = vsel %vm570_vm5, %v458_v45, %v634_v55  ;;  %vm555_vm7 = vcmp.gt.f32.partialorder %v420_v52, 0.0  ;;  %vm539_vm8 = vcmp.gt.f32.partialorder %v380_v51, 0.0  ;;  %v1273_v7 = vsel %vm1180_vm4, %v714_v57, -inf }
  0x9a   :  { %796 = vst.msk [vmem:[%s2644_s2 + $0x4] sm:$0xf] %vm794_vm1, %v731_v53  ;;  %1019 = vrot.lane.b32.xlu0 %v714_v57, %s1595_s9  ;;  %987 = vrot.lane.b32.xlu2 %v698_v58, %s1595_s9  ;;  %v1241_v59 = vsel %vm1180_vm4, %v698_v58, -inf  ;;  %v683_v11 = vsel %vm555_vm7, %v420_v52, %v619_v61  ;;  %v667_v12 = vsel %vm539_vm8, %v380_v51, %v603_v60 }
  0x9b   :  { %812 = vst.msk [vmem:[%s2644_s2 + $0x44] sm:$0xf] %vm794_vm1, %v747_v54  ;;  %v1188_v62 = vmax.f32 %v1241_v59, %v1186_v56  ;;  %v1211_v16 = vsel %vm1180_vm4, %v683_v11, -inf  ;;  %v1182_v28 = vsel %vm1180_vm4, %v667_v12, -inf }
  0x9d   :  { %v460_v63 = vpop.f32.mrf.mxu2  ;;  %v500_v0 = vpop.f32.mrf.mxu3  ;;  %v1190_v9 = vmax.f32 %v1273_v7, %v1188_v62 }
  0x9e   :  { %v763_v1 = vpack.c.bf16 %v460_v63, %v460_v63  ;;  %v651_v2 = vmul.f32 0.2, %v500_v0  ;;  %v383_v3 = vpop.f32.mrf.mxu0  ;;  %v1793_v4 = vpop.f32.mrf.mxu1  ;;  %v779_v5 = vpack.c.bf16 %v500_v0, %v500_v0  ;;  %vm587_vm9 = vcmp.gt.f32.partialorder %v500_v0, 0.0 }
  0x9f   :  { %v732_v6 = vpack.c.bf16 %v383_v3, %v383_v3  ;;  %v748_v8 = vpack.c.bf16 %v1793_v4, %v1793_v4  ;;  %v604_v14 = vmul.f32 0.2, %v383_v3  ;;  %vm540_vm10 = vcmp.gt.f32.partialorder %v383_v3, 0.0 }
  0xa0   :  { %828 = vst.msk [vmem:[%s2644_s2 + $0x84] sm:$0xf] %vm794_vm1, %v763_v1  ;;  %v715_v10 = vsel %vm587_vm9, %v500_v0, %v651_v2  ;;  %v635_v17 = vmul.f32 0.2, %v460_v63  ;;  %vm571_vm11 = vcmp.gt.f32.partialorder %v460_v63, 0.0  ;;  %vm556_vm14 = vcmp.gt.f32.partialorder %v1793_v4, 0.0 }
  0xa1   :  { %844 = vst.msk [vmem:[%s2644_s2 + $0xc4] sm:$0xf] %vm794_vm1, %v779_v5  ;;  %v1275_v13 = vsel %vm1180_vm4, %v715_v10, -inf  ;;  %1021 = vrot.lane.b32.xlu1 %v715_v10, %s1595_s9  ;;  %v668_v27 = vsel %vm540_vm10, %v383_v3, %v604_v14  ;;  %v620_v37 = vmul.f32 0.2, %v1793_v4 }
  0xa2   :  { %797 = vst.msk [vmem:[%s2644_s2 + $0x8] sm:$0xf] %vm794_vm1, %v732_v6  ;;  %925 = vrot.lane.b32.xlu0 %v667_v12, %s1595_s9  ;;  %v1192_v15 = vmax.f32 %v1275_v13, %v1190_v9  ;;  %957 = vrot.lane.b32.xlu2 %v683_v11, %s1595_s9  ;;  %v699_v32 = vsel %vm571_vm11, %v460_v63, %v635_v17  ;;  %v1183_v36 = vsel %vm1180_vm4, %v668_v27, -inf }
  0xa3   :  { %813 = vst.msk [vmem:[%s2644_s2 + $0x48] sm:$0xf] %vm794_vm1, %v748_v8  ;;  %v1243_v39 = vsel %vm1180_vm4, %v699_v32, -inf  ;;  %v684_v55 = vsel %vm556_vm14, %v1793_v4, %v620_v37 }
  0xa4   :  { %v1194_v18 = vmax.f32 %v1211_v16, %v1192_v15  ;;  %v1213_v63 = vsel %vm1180_vm4, %v684_v55, -inf }
  0xa5   :  { %v463_v19 = vpop.f32.mrf.mxu2  ;;  %v503_v20 = vpop.f32.mrf.mxu3 }
  0xa6   :  { %v764_v21 = vpack.c.bf16 %v463_v19, %v463_v19  ;;  %v652_v22 = vmul.f32 0.2, %v503_v20  ;;  %v780_v23 = vpack.c.bf16 %v503_v20, %v503_v20  ;;  %v385_v24 = vpop.f32.mrf.mxu0  ;;  %v1819_v25 = vpop.f32.mrf.mxu1  ;;  %vm588_vm12 = vcmp.gt.f32.partialorder %v503_v20, 0.0 }
  0xa7   :  { %v733_v26 = vpack.c.bf16 %v385_v24, %v385_v24  ;;  %v749_v29 = vpack.c.bf16 %v1819_v25, %v1819_v25  ;;  %v1196_v30 = vmax.f32 %v1182_v28, %v1194_v18  ;;  %v636_v34 = vmul.f32 0.2, %v463_v19 }
  0xa8   :  { %829 = vst.msk [vmem:[%s2644_s2 + $0x88] sm:$0xf] %vm794_vm1, %v764_v21  ;;  %v716_v31 = vsel %vm588_vm12, %v503_v20, %v652_v22  ;;  %vm572_vm13 = vcmp.gt.f32.partialorder %v463_v19, 0.0  ;;  %v605_v42 = vmul.f32 0.2, %v385_v24  ;;  %vm541_vm0 = vcmp.gt.f32.partialorder %v385_v24, 0.0 }
  0xa9   :  { %845 = vst.msk [vmem:[%s2644_s2 + $0xc8] sm:$0xf] %vm794_vm1, %v780_v23  ;;  %v1277_v33 = vsel %vm1180_vm4, %v716_v31, -inf  ;;  %927 = vrot.lane.b32.xlu1 %v668_v27, %s1595_s9  ;;  %v700_v49 = vsel %vm572_vm13, %v463_v19, %v636_v34  ;;  %v621_v62 = vmul.f32 0.2, %v1819_v25  ;;  %vm557_vm5 = vcmp.gt.f32.partialorder %v1819_v25, 0.0 }
  0xaa   :  { %798 = vst.msk [vmem:[%s2644_s2 + $0xc] sm:$0xf] %vm794_vm1, %v733_v26  ;;  %989 = vrot.lane.b32.xlu0 %v699_v32, %s1595_s9  ;;  %v1198_v35 = vmax.f32 %v1277_v33, %v1196_v30  ;;  %1023 = vrot.lane.b32.xlu2 %v716_v31, %s1595_s9  ;;  %v1245_v57 = vsel %vm1180_vm4, %v700_v49, -inf  ;;  %v669_v58 = vsel %vm541_vm0, %v385_v24, %v605_v42 }
  0xab   :  { %814 = vst.msk [vmem:[%s2644_s2 + $0x4c] sm:$0xf] %vm794_vm1, %v749_v29  ;;  %v1184_v7 = vsel %vm1180_vm4, %v669_v58, -inf  ;;  %v685_v16 = vsel %vm557_vm5, %v1819_v25, %v621_v62 }
  0xac   :  { %v1200_v38 = vmax.f32 %v1183_v36, %v1198_v35  ;;  %v1215_v24 = vsel %vm1180_vm4, %v685_v16, -inf }
  0xad   :  { %v465_v40 = vpop.f32.mrf.mxu2  ;;  %v505_v41 = vpop.f32.mrf.mxu3 }
  0xae   :  { %v637_v43 = vmul.f32 0.2, %v465_v40  ;;  %v765_v44 = vpack.c.bf16 %v465_v40, %v465_v40  ;;  %v388_v45 = vpop.f32.mrf.mxu0  ;;  %v428_v46 = vpop.f32.mrf.mxu1  ;;  %vm573_vm15 = vcmp.gt.f32.partialorder %v465_v40, 0.0  ;;  %v1202_v47 = vmax.f32 %v1243_v39, %v1200_v38 }
  0xaf   :  { %v734_v48 = vpack.c.bf16 %v388_v45, %v388_v45  ;;  %v606_v50 = vmul.f32 0.2, %v388_v45  ;;  %v750_v51 = vpack.c.bf16 %v428_v46, %v428_v46  ;;  %v781_v53 = vpack.c.bf16 %v505_v41, %v505_v41 }
  0xb0   :  { %830 = vst.msk [vmem:[%s2644_s2 + $0x8c] sm:$0xf] %vm794_vm1, %v765_v44  ;;  %v701_v52 = vsel %vm573_vm15, %v465_v40, %v637_v43  ;;  %vm542_vm2 = vcmp.gt.f32.partialorder %v388_v45, 0.0  ;;  %v653_v60 = vmul.f32 0.2, %v505_v41  ;;  %vm589_vm3 = vcmp.gt.f32.partialorder %v505_v41, 0.0 }
  0xb1   :  { %799 = vst.msk [vmem:[%s2644_s2 + $0x10] sm:$0xf] %vm794_vm1, %v734_v48  ;;  %v1247_v54 = vsel %vm1180_vm4, %v701_v52, -inf  ;;  %991 = vrot.lane.b32.xlu1 %v700_v49, %s1595_s9  ;;  %v670_v61 = vsel %vm542_vm2, %v388_v45, %v606_v50  ;;  %v622_v2 = vmul.f32 0.2, %v428_v46  ;;  %vm558_vm6 = vcmp.gt.f32.partialorder %v428_v46, 0.0 }
  0xb2   :  { %815 = vst.msk [vmem:[%s2644_s2 + $0x50] sm:$0xf] %vm794_vm1, %v750_v51  ;;  %v1210_v56 = vmax.f32 %v1202_v47, %v1247_v54  ;;  %959 = vrot.lane.b32.xlu0 %v684_v55, %s1595_s9  ;;  %993 = vrot.lane.b32.xlu2 %v701_v52, %s1595_s9  ;;  %v1185_v10 = vsel %vm1180_vm4, %v670_v61, -inf  ;;  %v717_v14 = vsel %vm589_vm3, %v505_v41, %v653_v60 }
  0xb3   :  { %846 = vst.msk [vmem:[%s2644_s2 + $0xcc] sm:$0xf] %vm794_vm1, %v781_v53  ;;  %v686_v17 = vsel %vm558_vm6, %v428_v46, %v622_v2  ;;  %v1279_v18 = vsel %vm1180_vm4, %v717_v14, -inf }
  0xb4   :  { %v1218_v59 = vmax.f32 %v1210_v56, %v1245_v57  ;;  %v1217_v26 = vsel %vm1180_vm4, %v686_v17, -inf }
  0xb5   :  { %v468_v0 = vpop.f32.mrf.mxu2  ;;  %v508_v1 = vpop.f32.mrf.mxu3 }
  0xb6   :  { %v1226_v3 = vmax.f32 %v1218_v59, %v1213_v63  ;;  %v766_v4 = vpack.c.bf16 %v468_v0, %v468_v0  ;;  %v1876_v5 = vpop.f32.mrf.mxu0  ;;  %v430_v6 = vpop.f32.mrf.mxu1  ;;  %v638_v11 = vmul.f32 0.2, %v468_v0  ;;  %v782_v13 = vpack.c.bf16 %v508_v1, %v508_v1 }
  0xb7   :  { %v735_v8 = vpack.c.bf16 %v1876_v5, %v1876_v5  ;;  %v751_v9 = vpack.c.bf16 %v430_v6, %v430_v6  ;;  %vm574_vm7 = vcmp.gt.f32.partialorder %v468_v0, 0.0  ;;  %v623_v21 = vmul.f32 0.2, %v430_v6 }
  0xb8   :  { %831 = vst.msk [vmem:[%s2644_s2 + $0x90] sm:$0xf] %vm794_vm1, %v766_v4  ;;  %v1234_v12 = vmax.f32 %v1226_v3, %v1184_v7  ;;  %v702_v20 = vsel %vm574_vm7, %v468_v0, %v638_v11  ;;  %v654_v22 = vmul.f32 0.2, %v508_v1  ;;  %vm590_vm8 = vcmp.gt.f32.partialorder %v508_v1, 0.0 }
  0xb9   :  { %800 = vst.msk [vmem:[%s2644_s2 + $0x14] sm:$0xf] %vm794_vm1, %v735_v8  ;;  %929 = vrot.lane.b32.xlu1 %v669_v58, %s1595_s9  ;;  %v1249_v34 = vsel %vm1180_vm4, %v702_v20, -inf  ;;  %vm559_vm9 = vcmp.gt.f32.partialorder %v430_v6, 0.0  ;;  %v607_v43 = vmul.f32 0.2, %v1876_v5 }
  0xba   :  { %816 = vst.msk [vmem:[%s2644_s2 + $0x54] sm:$0xf] %vm794_vm1, %v751_v9  ;;  %v1242_v15 = vmax.f32 %v1234_v12, %v1185_v10  ;;  %1025 = vrot.lane.b32.xlu0 %v717_v14, %s1595_s9  ;;  %931 = vrot.lane.b32.xlu2 %v670_v61, %s1595_s9  ;;  %v718_v40 = vsel %vm590_vm8, %v508_v1, %v654_v22  ;;  %vm543_vm12 = vcmp.gt.f32.partialorder %v1876_v5, 0.0 }
  0xbb   :  { %847 = vst.msk [vmem:[%s2644_s2 + $0xd0] sm:$0xf] %vm794_vm1, %v782_v13  ;;  %v687_v42 = vsel %vm559_vm9, %v430_v6, %v623_v21  ;;  %v1281_v47 = vsel %vm1180_vm4, %v718_v40, -inf  ;;  %v671_v60 = vsel %vm543_vm12, %v1876_v5, %v607_v43 }
  0xbc   :  { %v1250_v19 = vmax.f32 %v1242_v15, %v1279_v18  ;;  %v1219_v53 = vsel %vm1180_vm4, %v687_v42, -inf  ;;  %v1187_v0 = vsel %vm1180_vm4, %v671_v60, -inf }
  0xbd   :  { %v470_v23 = vpop.f32.mrf.mxu2  ;;  %v510_v25 = vpop.f32.mrf.mxu3 }
  0xbe   :  { %v639_v27 = vmul.f32 0.2, %v470_v23  ;;  %v767_v28 = vpack.c.bf16 %v470_v23, %v470_v23  ;;  %v1908_v29 = vpop.f32.mrf.mxu0  ;;  %v433_v30 = vpop.f32.mrf.mxu1  ;;  %v1258_v31 = vmax.f32 %v1250_v19, %v1215_v24  ;;  %v783_v37 = vpack.c.bf16 %v510_v25, %v510_v25 }
  0xbf   :  { %v736_v32 = vpack.c.bf16 %v1908_v29, %v1908_v29  ;;  %v752_v33 = vpack.c.bf16 %v433_v30, %v433_v30  ;;  %v624_v35 = vmul.f32 0.2, %v433_v30  ;;  %vm575_vm10 = vcmp.gt.f32.partialorder %v470_v23, 0.0 }
  0xc0   :  { %832 = vst.msk [vmem:[%s2644_s2 + $0x94] sm:$0xf] %vm794_vm1, %v767_v28  ;;  %v1266_v36 = vmax.f32 %v1258_v31, %v1217_v26  ;;  %v703_v38 = vsel %vm575_vm10, %v470_v23, %v639_v27  ;;  %vm560_vm11 = vcmp.gt.f32.partialorder %v433_v30, 0.0  ;;  %v655_v54 = vmul.f32 0.2, %v510_v25 }
  0xc1   :  { %801 = vst.msk [vmem:[%s2644_s2 + $0x18] sm:$0xf] %vm794_vm1, %v736_v32  ;;  %961 = vrot.lane.b32.xlu1 %v685_v16, %s1595_s9  ;;  %v1251_v41 = vsel %vm1180_vm4, %v703_v38, -inf  ;;  %v688_v45 = vsel %vm560_vm11, %v433_v30, %v624_v35  ;;  %vm591_vm13 = vcmp.gt.f32.partialorder %v510_v25, 0.0  ;;  %v608_v2 = vmul.f32 0.2, %v1908_v29 }
  0xc2   :  { %817 = vst.msk [vmem:[%s2644_s2 + $0x58] sm:$0xf] %vm794_vm1, %v752_v33  ;;  %v1204_v39 = vmax.f32 %v1249_v34, %v1266_v36  ;;  %995 = vrot.lane.b32.xlu0 %v702_v20, %s1595_s9  ;;  %963 = vrot.lane.b32.xlu2 %v686_v17, %s1595_s9  ;;  %v1221_v57 = vsel %vm1180_vm4, %v688_v45, -inf  ;;  %v719_v1 = vsel %vm591_vm13, %v510_v25, %v655_v54  ;;  %vm544_vm0 = vcmp.gt.f32.partialorder %v1908_v29, 0.0 }
  0xc3   :  { %848 = vst.msk [vmem:[%s2644_s2 + $0xd4] sm:$0xf] %vm794_vm1, %v783_v37  ;;  %v1283_v9 = vsel %vm1180_vm4, %v719_v1, -inf  ;;  %v672_v18 = vsel %vm544_vm0, %v1908_v29, %v608_v2 }
  0xc4   :  { %v1212_v44 = vmax.f32 %v1204_v39, %v1251_v41  ;;  %v1189_v23 = vsel %vm1180_vm4, %v672_v18, -inf }
  0xc5   :  { %v473_v46 = vpop.f32.mrf.mxu2  ;;  %v513_v48 = vpop.f32.mrf.mxu3 }
  0xc6   :  { %v1938_v49 = vpop.f32.mrf.mxu0  ;;  %v435_v50 = vpop.f32.mrf.mxu1  ;;  %v768_v51 = vpack.c.bf16 %v473_v46, %v473_v46  ;;  %v1220_v52 = vmax.f32 %v1212_v44, %v1281_v47  ;;  %v784_v58 = vpack.c.bf16 %v513_v48, %v513_v48  ;;  %v640_v61 = vmul.f32 0.2, %v473_v46 }
  0xc7   :  { %v737_v55 = vpack.c.bf16 %v1938_v49, %v1938_v49  ;;  %v753_v56 = vpack.c.bf16 %v435_v50, %v435_v50  ;;  %v656_v62 = vmul.f32 0.2, %v513_v48  ;;  %vm592_vm14 = vcmp.gt.f32.partialorder %v513_v48, 0.0 }
  0xc8   :  { %833 = vst.msk [vmem:[%s2644_s2 + $0x98] sm:$0xf] %vm794_vm1, %v768_v51  ;;  %v1228_v59 = vmax.f32 %v1220_v52, %v1219_v53  ;;  %vm576_vm15 = vcmp.gt.f32.partialorder %v473_v46, 0.0  ;;  %v625_v12 = vmul.f32 0.2, %v435_v50  ;;  %vm561_vm2 = vcmp.gt.f32.partialorder %v435_v50, 0.0 }
  0xc9   :  { %802 = vst.msk [vmem:[%s2644_s2 + $0x1c] sm:$0xf] %vm794_vm1, %v737_v55  ;;  %997 = vrot.lane.b32.xlu1 %v703_v38, %s1595_s9  ;;  %v720_v10 = vsel %vm592_vm14, %v513_v48, %v656_v62  ;;  %v704_v11 = vsel %vm576_vm15, %v473_v46, %v640_v61  ;;  %v609_v16 = vmul.f32 0.2, %v1938_v49  ;;  %vm545_vm3 = vcmp.gt.f32.partialorder %v1938_v49, 0.0 }
  0xca   :  { %818 = vst.msk [vmem:[%s2644_s2 + $0x5c] sm:$0xf] %vm794_vm1, %v753_v56  ;;  %965 = vrot.lane.b32.xlu0 %v687_v42, %s1595_s9  ;;  %v1236_v63 = vmax.f32 %v1228_v59, %v1221_v57  ;;  %1027 = vrot.lane.b32.xlu2 %v718_v40, %s1595_s9  ;;  %v1285_v19 = vsel %vm1180_vm4, %v720_v10, -inf  ;;  %v1253_v20 = vsel %vm1180_vm4, %v704_v11, -inf  ;;  %v689_v24 = vsel %vm561_vm2, %v435_v50, %v625_v12 }
  0xcb   :  { %849 = vst.msk [vmem:[%s2644_s2 + $0xd8] sm:$0xf] %vm794_vm1, %v784_v58  ;;  %v673_v25 = vsel %vm545_vm3, %v1938_v49, %v609_v16  ;;  %v1223_v33 = vsel %vm1180_vm4, %v689_v24, -inf  ;;  %vm1115_vm2 = vcmask 261120  }
  0xcc   :  { %v1244_v3 = vmax.f32 %v1236_v63, %v1187_v0  ;;  %v1191_v38 = vsel %vm1180_vm4, %v673_v25, -inf }
  0xcd   :  { %v475_v4 = vpop.f32.mrf.mxu2  ;;  %v515_v5 = vpop.f32.mrf.mxu3 }
  0xce   :  { %v1967_v6 = vpop.f32.mrf.mxu0  ;;  %v1969_v7 = vpop.f32.mrf.mxu1  ;;  %v769_v8 = vpack.c.bf16 %v475_v4, %v475_v4  ;;  %v785_v15 = vpack.c.bf16 %v515_v5, %v515_v5  ;;  %v1252_v17 = vmax.f32 %v1244_v3, %v1283_v9  ;;  %v641_v21 = vmul.f32 0.2, %v475_v4 }
  0xcf   :  { %v738_v13 = vpack.c.bf16 %v1967_v6, %v1967_v6  ;;  %v754_v14 = vpack.c.bf16 %v1969_v7, %v1969_v7  ;;  %vm577_vm5 = vcmp.gt.f32.partialorder %v475_v4, 0.0  ;;  %v657_v35 = vmul.f32 0.2, %v515_v5 }
  0xd0   :  { %834 = vst.msk [vmem:[%s2644_s2 + $0x9c] sm:$0xf] %vm794_vm1, %v769_v8  ;;  %v1260_v22 = vmax.f32 %v1252_v17, %v1285_v19  ;;  %v705_v34 = vsel %vm577_vm5, %v475_v4, %v641_v21  ;;  %vm593_vm6 = vcmp.gt.f32.partialorder %v515_v5, 0.0  ;;  %v626_v42 = vmul.f32 0.2, %v1969_v7 }
  0xd1   :  { %803 = vst.msk [vmem:[%s2644_s2 + $0x20] sm:$0xf] %vm794_vm1, %v738_v13  ;;  %967 = vrot.lane.b32.xlu1 %v688_v45, %s1595_s9  ;;  %v1255_v43 = vsel %vm1180_vm4, %v705_v34, -inf  ;;  %vm562_vm8 = vcmp.gt.f32.partialorder %v1969_v7, 0.0  ;;  %v721_v45 = vsel %vm593_vm6, %v515_v5, %v657_v35  ;;  %v610_v48 = vmul.f32 0.2, %v1967_v6 }
  0xd2   :  { %819 = vst.msk [vmem:[%s2644_s2 + $0x60] sm:$0xf] %vm794_vm1, %v754_v14  ;;  %1029 = vrot.lane.b32.xlu0 %v719_v1, %s1595_s9  ;;  %933 = vrot.lane.b32.xlu2 %v671_v60, %s1595_s9  ;;  %v1268_v26 = vmax.f32 %v1260_v22, %v1253_v20  ;;  %v690_v51 = vsel %vm562_vm8, %v1969_v7, %v626_v42  ;;  %v1287_v56 = vsel %vm1180_vm4, %v721_v45, -inf  ;;  %vm546_vm10 = vcmp.gt.f32.partialorder %v1967_v6, 0.0 }
  0xd3   :  { %850 = vst.msk [vmem:[%s2644_s2 + $0xdc] sm:$0xf] %vm794_vm1, %v785_v15  ;;  %v1225_v62 = vsel %vm1180_vm4, %v690_v51, -inf  ;;  %v674_v1 = vsel %vm546_vm10, %v1967_v6, %v610_v48 }
  0xd4   :  { %v1276_v32 = vmax.f32 %v1268_v26, %v1189_v23  ;;  %v1193_v6 = vsel %vm1180_vm4, %v674_v1, -inf }
  0xd5   :  { %v478_v27 = vpop.f32.mrf.mxu2  ;;  %v2002_v28 = vpop.f32.mrf.mxu3 }
  0xd6   :  { %v2004_v29 = vpop.f32.mrf.mxu0  ;;  %v440_v30 = vpop.f32.mrf.mxu1  ;;  %v770_v31 = vpack.c.bf16 %v478_v27, %v478_v27  ;;  %v642_v39 = vmul.f32 0.2, %v478_v27  ;;  %v786_v40 = vpack.c.bf16 %v2002_v28, %v2002_v28  ;;  %v1206_v41 = vmax.f32 %v1223_v33, %v1276_v32 }
  0xd7   :  { %v739_v36 = vpack.c.bf16 %v2004_v29, %v2004_v29  ;;  %v755_v37 = vpack.c.bf16 %v440_v30, %v440_v30  ;;  %vm578_vm7 = vcmp.gt.f32.partialorder %v478_v27, 0.0  ;;  %v627_v52 = vmul.f32 0.2, %v440_v30 }
  0xd8   :  { %835 = vst.msk [vmem:[%s2644_s2 + $0xa0] sm:$0xf] %vm794_vm1, %v770_v31  ;;  %v1214_v44 = vmax.f32 %v1206_v41, %v1191_v38  ;;  %v706_v47 = vsel %vm578_vm7, %v478_v27, %v642_v39  ;;  %vm563_vm9 = vcmp.gt.f32.partialorder %v440_v30, 0.0  ;;  %v658_v2 = vmul.f32 0.2, %v2002_v28 }
  0xd9   :  { %804 = vst.msk [vmem:[%s2644_s2 + $0x24] sm:$0xf] %vm794_vm1, %v739_v36  ;;  %1031 = vrot.lane.b32.xlu1 %v720_v10, %s1595_s9  ;;  %v1257_v60 = vsel %vm1180_vm4, %v706_v47, -inf  ;;  %v691_v0 = vsel %vm563_vm9, %v440_v30, %v627_v52  ;;  %vm594_vm11 = vcmp.gt.f32.partialorder %v2002_v28, 0.0  ;;  %vm547_vm14 = vcmp.gt.f32.partialorder %v2004_v29, 0.0 }
  0xda   :  { %820 = vst.msk [vmem:[%s2644_s2 + $0x64] sm:$0xf] %vm794_vm1, %v755_v37  ;;  %935 = vrot.lane.b32.xlu0 %v672_v18, %s1595_s9  ;;  %999 = vrot.lane.b32.xlu2 %v704_v11, %s1595_s9  ;;  %v1222_v46 = vmax.f32 %v1214_v44, %v1255_v43  ;;  %v1227_v7 = vsel %vm1180_vm4, %v691_v0, -inf  ;;  %v722_v17 = vsel %vm594_vm11, %v2002_v28, %v658_v2  ;;  %v611_v18 = vmul.f32 0.2, %v2004_v29 }
  0xdb   :  { %851 = vst.msk [vmem:[%s2644_s2 + $0xe0] sm:$0xf] %vm794_vm1, %v786_v40  ;;  %v1289_v20 = vsel %vm1180_vm4, %v722_v17, -inf }
  0xdc   :  { %v1230_v61 = vmax.f32 %v1222_v46, %v1287_v56  ;;  %v675_v32 = vsel %vm547_vm14, %v2004_v29, %v611_v18 }
  0xdd   :  { %v480_v49 = vpop.f32.mrf.mxu2  ;;  %v520_v50 = vpop.f32.mrf.mxu3  ;;  %v1195_v38 = vsel %vm1180_vm4, %v675_v32, -inf }
  0xde   :  { %v2036_v53 = vpop.f32.mrf.mxu0  ;;  %v2038_v54 = vpop.f32.mrf.mxu1  ;;  %v771_v55 = vpack.c.bf16 %v480_v49, %v480_v49  ;;  %v787_v59 = vpack.c.bf16 %v520_v50, %v520_v50  ;;  %v1238_v63 = vmax.f32 %v1230_v61, %v1257_v60  ;;  %v659_v13 = vmul.f32 0.2, %v520_v50 }
  0xdf   :  { %v740_v57 = vpack.c.bf16 %v2036_v53, %v2036_v53  ;;  %v756_v58 = vpack.c.bf16 %v2038_v54, %v2038_v54  ;;  %v643_v15 = vmul.f32 0.2, %v480_v49  ;;  %vm595_vm12 = vcmp.gt.f32.partialorder %v520_v50, 0.0 }
  0xe0   :  { %836 = vst.msk [vmem:[%s2644_s2 + $0xa4] sm:$0xf] %vm794_vm1, %v771_v55  ;;  %v1246_v3 = vmax.f32 %v1238_v63, %v1225_v62  ;;  %vm579_vm13 = vcmp.gt.f32.partialorder %v480_v49, 0.0  ;;  %v723_v21 = vsel %vm595_vm12, %v520_v50, %v659_v13  ;;  %vm564_vm15 = vcmp.gt.f32.partialorder %v2038_v54, 0.0 }
  0xe1   :  { %805 = vst.msk [vmem:[%s2644_s2 + $0x28] sm:$0xf] %vm794_vm1, %v740_v57  ;;  %937 = vrot.lane.b32.xlu1 %v673_v25, %s1595_s9  ;;  %v707_v23 = vsel %vm579_vm13, %v480_v49, %v643_v15  ;;  %v1291_v31 = vsel %vm1180_vm4, %v723_v21, -inf  ;;  %v612_v29 = vmul.f32 0.2, %v2036_v53  ;;  %vm548_vm0 = vcmp.gt.f32.partialorder %v2036_v53, 0.0 }
  0xe2   :  { %821 = vst.msk [vmem:[%s2644_s2 + $0x68] sm:$0xf] %vm794_vm1, %v756_v58  ;;  %1001 = vrot.lane.b32.xlu0 %v705_v34, %s1595_s9  ;;  %969 = vrot.lane.b32.xlu2 %v689_v24, %s1595_s9  ;;  %v1254_v16 = vmax.f32 %v1246_v3, %v1227_v7  ;;  %v628_v24 = vmul.f32 0.2, %v2038_v54  ;;  %v1259_v36 = vsel %vm1180_vm4, %v707_v23, -inf }
  0xe3   :  { %852 = vst.msk [vmem:[%s2644_s2 + $0xe4] sm:$0xf] %vm794_vm1, %v787_v59  ;;  %v676_v46 = vsel %vm548_vm0, %v2036_v53, %v612_v29 }
  0xe4   :  { %v1262_v19 = vmax.f32 %v1254_v16, %v1193_v6  ;;  %v692_v39 = vsel %vm564_vm15, %v2038_v54, %v628_v24  ;;  %v1197_v55 = vsel %vm1180_vm4, %v676_v46, -inf }
  0xe5   :  { %v2069_v4 = vpop.f32.mrf.mxu2  ;;  %v2071_v5 = vpop.f32.mrf.mxu3  ;;  %v1229_v42 = vsel %vm1180_vm4, %v692_v39, -inf }
  0xe6   :  { %v2075_v8 = vpop.f32.mrf.mxu0  ;;  %v2077_v9 = vpop.f32.mrf.mxu1  ;;  %v772_v10 = vpack.c.bf16 %v2069_v4, %v2069_v4  ;;  %v788_v14 = vpack.c.bf16 %v2071_v5, %v2071_v5  ;;  %v1270_v22 = vmax.f32 %v1262_v19, %v1289_v20  ;;  %v644_v43 = vmul.f32 0.2, %v2069_v4 }
  0xe7   :  { %v741_v11 = vpack.c.bf16 %v2075_v8, %v2075_v8  ;;  %v757_v12 = vpack.c.bf16 %v2077_v9, %v2077_v9  ;;  %vm580_vm3 = vcmp.gt.f32.partialorder %v2069_v4, 0.0  ;;  %v660_v57 = vmul.f32 0.2, %v2071_v5 }
  0xe8   :  { %837 = vst.msk [vmem:[%s2644_s2 + $0xa8] sm:$0xf] %vm794_vm1, %v772_v10  ;;  %v1278_v37 = vmax.f32 %v1270_v22, %v1291_v31  ;;  %v708_v56 = vsel %vm580_vm3, %v2069_v4, %v644_v43  ;;  %vm596_vm5 = vcmp.gt.f32.partialorder %v2071_v5, 0.0  ;;  %v629_v6 = vmul.f32 0.2, %v2077_v9 }
  0xe9   :  { %806 = vst.msk [vmem:[%s2644_s2 + $0x2c] sm:$0xf] %vm794_vm1, %v741_v11  ;;  %1003 = vrot.lane.b32.xlu1 %v706_v47, %s1595_s9  ;;  %v1261_v59 = vsel %vm1180_vm4, %v708_v56, -inf  ;;  %v724_v10 = vsel %vm596_vm5, %v2071_v5, %v660_v57  ;;  %vm565_vm7 = vcmp.gt.f32.partialorder %v2077_v9, 0.0  ;;  %v613_v19 = vmul.f32 0.2, %v2075_v8 }
  0xea   :  { %822 = vst.msk [vmem:[%s2644_s2 + $0x6c] sm:$0xf] %vm794_vm1, %v757_v12  ;;  %971 = vrot.lane.b32.xlu0 %v690_v51, %s1595_s9  ;;  %1033 = vrot.lane.b32.xlu2 %v721_v45, %s1595_s9  ;;  %v1286_v40 = vmax.f32 %v1278_v37, %v1259_v36  ;;  %v1293_v5 = vsel %vm1180_vm4, %v724_v10, -inf  ;;  %v693_v16 = vsel %vm565_vm7, %v2077_v9, %v629_v6  ;;  %vm549_vm10 = vcmp.gt.f32.partialorder %v2075_v8, 0.0 }
  0xeb   :  { %853 = vst.msk [vmem:[%s2644_s2 + $0xe8] sm:$0xf] %vm794_vm1, %v788_v14 }
  0xec   :  { %v1208_v41 = vmax.f32 %v1195_v38, %v1286_v40  ;;  %v677_v40 = vsel %vm549_vm10, %v2075_v8, %v613_v19 }
  0xed   :  { %v2112_v26 = vpop.f32.mrf.mxu2  ;;  %v2114_v25 = vpop.f32.mrf.mxu3 }
  0xee   :  { %v2116_v27 = vpop.f32.mrf.mxu0  ;;  %v2118_v28 = vpop.f32.mrf.mxu1  ;;  %v773_v30 = vpack.c.bf16 %v2112_v26, %v2112_v26  ;;  %v789_v35 = vpack.c.bf16 %v2114_v25, %v2114_v25  ;;  %v1216_v53 = vmax.f32 %v1208_v41, %v1229_v42  ;;  %v645_v60 = vmul.f32 0.2, %v2112_v26 }
  0xef   :  { %v742_v33 = vpack.c.bf16 %v2116_v27, %v2116_v27  ;;  %v758_v34 = vpack.c.bf16 %v2118_v28, %v2118_v28  ;;  %vm581_vm6 = vcmp.gt.f32.partialorder %v2112_v26, 0.0  ;;  %vm566_vm9 = vcmp.gt.f32.partialorder %v2118_v28, 0.0 }
  0xf0   :  { %838 = vst.msk [vmem:[%s2644_s2 + $0xac] sm:$0xf] %vm794_vm1, %v773_v30  ;;  %v1224_v58 = vmax.f32 %v1216_v53, %v1197_v55  ;;  %v709_v12 = vsel %vm581_vm6, %v2112_v26, %v645_v60  ;;  %v1231_v26 = vsel %vm1180_vm4, %v693_v16, -inf  ;;  %vm597_vm11 = vcmp.gt.f32.partialorder %v2114_v25, 0.0 }
  0xf1   :  { %807 = vst.msk [vmem:[%s2644_s2 + $0x30] sm:$0xf] %vm794_vm1, %v742_v33  ;;  %973 = vrot.lane.b32.xlu1 %v691_v0, %s1595_s9  ;;  %v1263_v15 = vsel %vm1180_vm4, %v709_v12, -inf  ;;  %vm550_vm15 = vcmp.gt.f32.partialorder %v2116_v27, 0.0 }
  0xf2   :  { %823 = vst.msk [vmem:[%s2644_s2 + $0x70] sm:$0xf] %vm794_vm1, %v758_v34  ;;  %1035 = vrot.lane.b32.xlu0 %v722_v17, %s1595_s9  ;;  %939 = vrot.lane.b32.xlu2 %v674_v1, %s1595_s9  ;;  %v1232_v4 = vmax.f32 %v1224_v58, %v1261_v59  ;;  %v614_v58 = vmul.f32 0.2, %v2116_v27 }
  0xf3   :  { %854 = vst.msk [vmem:[%s2644_s2 + $0xec] sm:$0xf] %vm794_vm1, %v789_v35  ;;  %v661_v35 = vmul.f32 0.2, %v2114_v25 }
  0xf4   :  { %v988_v44 = vpop.permute.xlu2 %987  ;;  %v1240_v13 = vmax.f32 %v1232_v4, %v1293_v5  ;;  %v678_v5 = vsel %vm550_vm15, %v2116_v27, %v614_v58 }
  0xf5   :  { %v2157_v45 = vpop.f32.mrf.mxu2  ;;  %1148 = vst.msk [vmem:[%s2645_s3 + $0x100] sm:$0xff] %vm1115_vm2, %v988_v44  ;;  %v2175_v52 = vpop.f32.mrf.mxu3 }
  0xf6   :  { %v2164_v47 = vpop.f32.mrf.mxu0  ;;  %v2166_v48 = vpop.f32.mrf.mxu1  ;;  %v774_v49 = vpack.c.bf16 %v2157_v45, %v2157_v45  ;;  %v790_v54 = vpack.c.bf16 %v2175_v52, %v2175_v52  ;;  %v1248_v24 = vmax.f32 %v1240_v13, %v1263_v15  ;;  %v662_v44 = vmul.f32 0.2, %v2175_v52 }
  0xf7   :  { %v743_v50 = vpack.c.bf16 %v2164_v47, %v2164_v47  ;;  %v759_v51 = vpack.c.bf16 %v2166_v48, %v2166_v48  ;;  %vm598_vm13 = vcmp.gt.f32.partialorder %v2175_v52, 0.0  ;;  %v646_v55 = vmul.f32 0.2, %v2157_v45 }
  0xf8   :  { %839 = vst.msk [vmem:[%s2644_s2 + $0xb0] sm:$0xf] %vm794_vm1, %v774_v49  ;;  %v1256_v36 = vmax.f32 %v1248_v24, %v1231_v26  ;;  %v1199_v49 = vsel %vm1180_vm4, %v677_v40, -inf  ;;  %vm582_vm14 = vcmp.gt.f32.partialorder %v2157_v45, 0.0  ;;  %vm551_vm0 = vcmp.gt.f32.partialorder %v2164_v47, 0.0 }
  0xf9   :  { %808 = vst.msk [vmem:[%s2644_s2 + $0x34] sm:$0xf] %vm794_vm1, %v743_v50  ;;  %1037 = vrot.lane.b32.xlu1 %v723_v21, %s1595_s9  ;;  %v630_v21 = vmul.f32 0.2, %v2118_v28  ;;  %v725_v50 = vsel %vm597_vm11, %v2114_v25, %v661_v35  ;;  %v710_v6 = vsel %vm582_vm14, %v2157_v45, %v646_v55 }
  0xfa   :  { %824 = vst.msk [vmem:[%s2644_s2 + $0x74] sm:$0xf] %vm794_vm1, %v759_v51  ;;  %941 = vrot.lane.b32.xlu0 %v675_v32, %s1595_s9  ;;  %1005 = vrot.lane.b32.xlu2 %v707_v23, %s1595_s9  ;;  %v1295_v57 = vsel %vm1180_vm4, %v725_v50, -inf  ;;  %v1265_v45 = vsel %vm1180_vm4, %v710_v6, -inf }
  0xfb   :  { %855 = vst.msk [vmem:[%s2644_s2 + $0xf0] sm:$0xf] %vm794_vm1, %v790_v54  ;;  %v694_v29 = vsel %vm566_vm9, %v2118_v28, %v630_v21 }
  0xfc   :  { %v958_v61 = vpop.permute.xlu2 %957  ;;  %v1233_v8 = vsel %vm1180_vm4, %v694_v29, -inf }
  0xfd   :  { %v2204_v62 = vpop.f32.mrf.mxu2  ;;  %1133 = vst.msk [vmem:[%s2645_s3 + $0x88] sm:$0xff] %vm1115_vm2, %v958_v61  ;;  %v2221_v7 = vpop.f32.mrf.mxu3  ;;  %v726_v61 = vsel %vm598_vm13, %v2175_v52, %v662_v44 }
  0xfe   :  { %v2210_v63 = vpop.f32.mrf.mxu0  ;;  %v2212_v0 = vpop.f32.mrf.mxu1  ;;  %v775_v1 = vpack.c.bf16 %v2204_v62, %v2204_v62  ;;  %v791_v11 = vpack.c.bf16 %v2221_v7, %v2221_v7  ;;  %v1297_v52 = vsel %vm1180_vm4, %v726_v61, -inf  ;;  %v647_v13 = vmul.f32 0.2, %v2204_v62 }
  0xff   :  { %v744_v2 = vpack.c.bf16 %v2210_v63, %v2210_v63  ;;  %v760_v3 = vpack.c.bf16 %v2212_v0, %v2212_v0  ;;  %vm583_vm3 = vcmp.gt.f32.partialorder %v2204_v62, 0.0  ;;  %vm552_vm6 = vcmp.gt.f32.partialorder %v2210_v63, 0.0 }
 0x100   :  { %840 = vst.msk [vmem:[%s2644_s2 + $0xb4] sm:$0xf] %vm794_vm1, %v775_v1  ;;  %vm568_vm7 = vcmp.gt.f32.partialorder %v2212_v0, 0.0  ;;  %vm599_vm11 = vcmp.gt.f32.partialorder %v2221_v7, 0.0 }
 0x101   :  { %809 = vst.msk [vmem:[%s2644_s2 + $0x38] sm:$0xf] %vm794_vm1, %v744_v2  ;;  %943 = vrot.lane.b32.xlu1 %v676_v46, %s1595_s9 }
 0x102   :  { %825 = vst.msk [vmem:[%s2644_s2 + $0x78] sm:$0xf] %vm794_vm1, %v760_v3  ;;  %1007 = vrot.lane.b32.xlu0 %v708_v56, %s1595_s9  ;;  %975 = vrot.lane.b32.xlu2 %v692_v39, %s1595_s9  ;;  %v631_v3 = vmul.f32 0.2, %v2166_v48 }
 0x103   :  { %856 = vst.msk [vmem:[%s2644_s2 + $0xf4] sm:$0xf] %vm794_vm1, %v791_v11  ;;  %v615_v11 = vmul.f32 0.2, %v2164_v47 }
 0x104   :  { %v924_v14 = vpop.permute.xlu0 %923  ;;  %v1024_v17 = vpop.permute.xlu2 %1023 }
 0x105   :  { %1116 = vst.msk [vmem:[%s2645_s3] sm:$0xff] %vm1115_vm2, %v924_v14  ;;  %v2255_v18 = vpop.f32.mrf.mxu2  ;;  %v533_v30 = vpop.f32.mrf.mxu3  ;;  %v679_v19 = vsel %vm551_vm0, %v2164_v47, %v615_v11 }
 0x106   :  { %1166 = vst.msk [vmem:[%s2645_s3 + $0x190] sm:$0xff] %vm1115_vm2, %v1024_v17  ;;  %v2262_v20 = vpop.f32.mrf.mxu0  ;;  %v776_v9 = vpack.c.bf16 %v2255_v18, %v2255_v18  ;;  %v2269_v23 = vpop.f32.mrf.mxu1  ;;  %vm600_vm8 = vcmp.gt.f32.partialorder %v533_v30, 0.0  ;;  %v792_v33 = vpack.c.bf16 %v533_v30, %v533_v30  ;;  %v664_v34 = vmul.f32 0.2, %v533_v30 }
 0x107   :  { %v745_v22 = vpack.c.bf16 %v2262_v20, %v2262_v20  ;;  %v761_v31 = vpack.c.bf16 %v2269_v23, %v2269_v23  ;;  %v956_v32 = vpop.permute.xlu1 %955  ;;  %v648_v17 = vmul.f32 0.2, %v2255_v18  ;;  %vm584_vm5 = vcmp.gt.f32.partialorder %v2255_v18, 0.0 }
 0x108   :  { %841 = vst.msk [vmem:[%s2644_s2 + $0xb8] sm:$0xf] %vm794_vm1, %v776_v9  ;;  %v2296_v37 = vsel %vm600_vm8, %v533_v30, %v664_v34  ;;  %v711_v30 = vsel %vm583_vm3, %v2204_v62, %v647_v13  ;;  %v1203_v47 = vsel %vm1180_vm4, %v679_v19, -inf  ;;  %v633_v34 = vmul.f32 0.2, %v2269_v23 }
 0x109   :  { %810 = vst.msk [vmem:[%s2644_s2 + $0x3c] sm:$0xf] %vm794_vm1, %v745_v22  ;;  %1009 = vrot.lane.b32.xlu1 %v709_v12, %s1595_s9  ;;  %v1301_v39 = vsel %vm1180_vm4, %v2296_v37, -inf  ;;  %v1267_v62 = vsel %vm1180_vm4, %v711_v30, -inf  ;;  %vm569_vm8 = vcmp.gt.f32.partialorder %v2269_v23, 0.0  ;;  %vm553_vm10 = vcmp.gt.f32.partialorder %v2262_v20, 0.0 }
 0x10a   :  { %826 = vst.msk [vmem:[%s2644_s2 + $0x7c] sm:$0xf] %vm794_vm1, %v761_v31  ;;  %977 = vrot.lane.b32.xlu0 %v693_v16, %s1595_s9  ;;  %1039 = vrot.lane.b32.xlu2 %v724_v10, %s1595_s9  ;;  %v1264_v42 = vmax.f32 %v1256_v36, %v1301_v39  ;;  %v1201_v16 = vsel %vm1180_vm4, %v678_v5, -inf  ;;  %v632_v31 = vmul.f32 0.2, %v2212_v0  ;;  %v697_v44 = vsel %vm569_vm8, %v2269_v23, %v633_v34 }
 0x10b   :  { %1132 = vst.msk [vmem:[%s2645_s3 + $0x80] sm:$0xff] %vm1115_vm2, %v956_v32  ;;  %v1239_v23 = vsel %vm1180_vm4, %v697_v44, -inf }
 0x10c   :  { %v1020_v38 = vpop.permute.xlu0 %1019  ;;  %857 = vst.msk [vmem:[%s2644_s2 + $0xf8] sm:$0xf] %vm794_vm1, %v792_v33  ;;  %v994_v41 = vpop.permute.xlu2 %993  ;;  %v1272_v46 = vmax.f32 %v1264_v42, %v1233_v8  ;;  %v712_v33 = vsel %vm584_vm5, %v2255_v18, %v648_v17  ;;  %v696_v39 = vsel %vm568_vm7, %v2212_v0, %v632_v31  ;;  %v617_v42 = vmul.f32 0.2, %v2262_v20 }
 0x10d   :  { %1164 = vst.msk [vmem:[%s2645_s3 + $0x180] sm:$0xff] %vm1115_vm2, %v1020_v38  ;;  %v2311_v28 = vpop.f32.mrf.mxu2  ;;  %v535_v51 = vpop.f32.mrf.mxu3  ;;  %v1237_v0 = vsel %vm1180_vm4, %v696_v39, -inf }
 0x10e   :  { %1151 = vst.msk [vmem:[%s2645_s3 + $0x118] sm:$0xff] %vm1115_vm2, %v994_v41  ;;  %v777_v43 = vpack.c.bf16 %v2311_v28, %v2311_v28  ;;  %vm601_vm12 = vcmp.gt.f32.partialorder %v535_v51, 0.0  ;;  %v665_v53 = vmul.f32 0.2, %v535_v51  ;;  %v793_v54 = vpack.c.bf16 %v535_v51, %v535_v51 }
 0x10f   :  { %v1284_v56 = vmax.f32 %v1199_v49, %v1272_v46  ;;  %v649_v38 = vmul.f32 0.2, %v2311_v28  ;;  %vm585_vm9 = vcmp.gt.f32.partialorder %v2311_v28, 0.0  ;;  %v663_v46 = vmul.f32 0.2, %v2221_v7 }
 0x110   :  { %842 = vst.msk [vmem:[%s2644_s2 + $0xbc] sm:$0xf] %vm794_vm1, %v777_v43  ;;  %v2332_v25 = vsel %vm601_vm12, %v535_v51, %v665_v53  ;;  %v681_v53 = vsel %vm553_vm10, %v2262_v20, %v617_v42 }
 0x111   :  { %979 = vrot.lane.b32.xlu1 %v694_v29, %s1595_s9  ;;  %858 = vst.msk [vmem:[%s2644_s2 + $0xfc] sm:$0xf] %vm794_vm1, %v793_v54  ;;  %v1292_v59 = vmax.f32 %v1284_v56, %v1295_v57  ;;  %v1303_v60 = vsel %vm1180_vm4, %v2332_v25, -inf  ;;  %vm567_vm1 = vcmp.gt.f32.partialorder %v2166_v48, 0.0  ;;  %v1269_v29 = vsel %vm1180_vm4, %v712_v33, -inf }
 0x112   :  { %1041 = vrot.lane.b32.xlu0 %v725_v50, %s1595_s9  ;;  %945 = vrot.lane.b32.xlu2 %v677_v40, %s1595_s9  ;;  %v695_v15 = vsel %vm567_vm1, %v2166_v48, %v631_v3  ;;  %v616_v48 = vmul.f32 0.2, %v2210_v63  ;;  %v713_v50 = vsel %vm585_vm9, %v2311_v28, %v649_v38  ;;  %v727_v56 = vsel %vm599_vm11, %v2221_v7, %v663_v46 }
 0x113   :  { %v1022_v1 = vpop.permute.xlu1 %1021  ;;  %v1300_v10 = vmax.f32 %v1292_v59, %v1303_v60  ;;  %v1235_v22 = vsel %vm1180_vm4, %v695_v15, -inf  ;;  %v1271_v54 = vsel %vm1180_vm4, %v713_v50, -inf  ;;  %v1207_v58 = vsel %vm1180_vm4, %v681_v53, -inf }
 0x114   :  { %v926_v2 = vpop.permute.xlu0 %925  ;;  %1165 = vst.msk [vmem:[%s2645_s3 + $0x188] sm:$0xff] %vm1115_vm2, %v1022_v1  ;;  %v932_v4 = vpop.permute.xlu2 %931  ;;  %v680_v36 = vsel %vm552_vm6, %v2210_v63, %v616_v48  ;;  %v1299_v60 = vsel %vm1180_vm4, %v727_v56, -inf }
 0x115   :  { %1120 = vst.msk [vmem:[%s2645_s3 + $0x20] sm:$0xff] %vm1115_vm2, %v932_v4  ;;  %v1274_v12 = vmax.f32 %v1297_v52, %v1300_v10  ;;  %v1205_v63 = vsel %vm1180_vm4, %v680_v36, -inf }
 0x116   :  { %1117 = vst.msk [vmem:[%s2645_s3 + $0x8] sm:$0xff] %vm1115_vm2, %v926_v2 }
 0x117   :  { %v1280_v14 = vmax.f32 %v1265_v45, %v1274_v12 }
 0x119   :  { %1043 = vrot.lane.b32.xlu1 %v726_v61, %s1595_s9  ;;  %v1282_v27 = vmax.f32 %v1201_v16, %v1280_v14 }
 0x11a   :  { %947 = vrot.lane.b32.xlu0 %v678_v5, %s1595_s9  ;;  %1011 = vrot.lane.b32.xlu2 %v710_v6, %s1595_s9 }
 0x11b   :  { %v928_v9 = vpop.permute.xlu1 %927  ;;  %v1288_v26 = vmax.f32 %v1235_v22, %v1282_v27 }
 0x11c   :  { %v990_v21 = vpop.permute.xlu0 %989  ;;  %1118 = vst.msk [vmem:[%s2645_s3 + $0x10] sm:$0xff] %vm1115_vm2, %v928_v9  ;;  %v964_v24 = vpop.permute.xlu2 %963 }
 0x11d   :  { %1136 = vst.msk [vmem:[%s2645_s3 + $0xa0] sm:$0xff] %vm1115_vm2, %v964_v24  ;;  %v1290_v32 = vmax.f32 %v1203_v47, %v1288_v26 }
 0x11e   :  { %1149 = vst.msk [vmem:[%s2645_s3 + $0x108] sm:$0xff] %vm1115_vm2, %v990_v21 }
 0x11f   :  { %v1294_v35 = vmax.f32 %v1267_v62, %v1290_v32 }
 0x121   :  { %949 = vrot.lane.b32.xlu1 %v679_v19, %s1595_s9  ;;  %v1296_v18 = vmax.f32 %v1269_v29, %v1294_v35 }
 0x122   :  { %1013 = vrot.lane.b32.xlu0 %v711_v30, %s1595_s9  ;;  %981 = vrot.lane.b32.xlu2 %v695_v15, %s1595_s9 }
 0x123   :  { %v992_v40 = vpop.permute.xlu1 %991  ;;  %v1298_v8 = vmax.f32 %v1205_v63, %v1296_v18 }
 0x124   :  { %v960_v41 = vpop.permute.xlu0 %959  ;;  %1150 = vst.msk [vmem:[%s2645_s3 + $0x110] sm:$0xff] %vm1115_vm2, %v992_v40  ;;  %v1028_v43 = vpop.permute.xlu2 %1027 }
 0x125   :  { %1168 = vst.msk [vmem:[%s2645_s3 + $0x1a0] sm:$0xff] %vm1115_vm2, %v1028_v43  ;;  %v1302_v49 = vmax.f32 %v1237_v0, %v1298_v8 }
 0x126   :  { %1134 = vst.msk [vmem:[%s2645_s3 + $0x90] sm:$0xff] %vm1115_vm2, %v960_v41 }
 0x127   :  { %v1304_v51 = vmax.f32 %v1239_v23, %v1302_v49 }
 0x129   :  { %1015 = vrot.lane.b32.xlu1 %v712_v33, %s1595_s9  ;;  %v1305_v55 = vmax.f32 %v1271_v54, %v1304_v51 }
 0x12a   :  { %983 = vrot.lane.b32.xlu0 %v696_v39, %s1595_s9  ;;  %951 = vrot.lane.b32.xlu2 %v680_v36, %s1595_s9 }
 0x12b   :  { %v930_v57 = vpop.permute.xlu1 %929  ;;  %v1306_v59 = vmax.f32 %v1207_v58, %v1305_v55 }
 0x12c   :  { %v1026_v28 = vpop.permute.xlu0 %1025  ;;  %1119 = vst.msk [vmem:[%s2645_s3 + $0x18] sm:$0xff] %vm1115_vm2, %v930_v57  ;;  %v934_v20 = vpop.permute.xlu2 %933 }
 0x12d   :  { %1121 = vst.msk [vmem:[%s2645_s3 + $0x28] sm:$0xff] %vm1115_vm2, %v934_v20  ;;  %v1307_v7 = vmax.f32 %v1299_v60, %v1306_v59 }
 0x12e   :  { %1167 = vst.msk [vmem:[%s2645_s3 + $0x198] sm:$0xff] %vm1115_vm2, %v1026_v28 }
 0x12f   :  { %v1308_v61 = vrot.slane %v1307_v7, 4 }
 0x131   :  { %985 = vrot.lane.b32.xlu1 %v697_v44, %s1595_s9  ;;  %v1309_v1 = vmax.f32 %v1307_v7, %v1308_v61 }
 0x132   :  { %953 = vrot.lane.b32.xlu0 %v681_v53, %s1595_s9  ;;  %1017 = vrot.lane.b32.xlu2 %v713_v50, %s1595_s9 }
 0x133   :  { %v962_v2 = vpop.permute.xlu1 %961  ;;  %v1310_v10 = vrot.slane %v1309_v1, 2 }
 0x134   :  { %v996_v3 = vpop.permute.xlu0 %995  ;;  %1135 = vst.msk [vmem:[%s2645_s3 + $0x98] sm:$0xff] %vm1115_vm2, %v962_v2  ;;  %v1000_v4 = vpop.permute.xlu2 %999 }
 0x135   :  { %1154 = vst.msk [vmem:[%s2645_s3 + $0x130] sm:$0xff] %vm1115_vm2, %v1000_v4  ;;  %v1311_v6 = vmax.f32 %v1309_v1, %v1310_v10 }
 0x136   :  { %1152 = vst.msk [vmem:[%s2645_s3 + $0x120] sm:$0xff] %vm1115_vm2, %v996_v3 }
 0x137   :  { %v1312_v52 = vrot.slane %v1311_v6, 1 }
 0x139   :  { %v1313_v11 = vmax.f32 %v1311_v6, %v1312_v52 }
 0x13a   :  { %1047 = vrot.lane.b32.xlu0 %v2296_v37, %s1595_s9  ;;  %1045 = vrot.lane.b32.xlu2 %v727_v56, %s1595_s9 }
 0x13b   :  { %v998_v12 = vpop.permute.xlu1 %997  ;;  %1315 = vrot.lane.b32.xlu1 %v1313_v11, %s1595_s9 }
 0x13c   :  { %v966_v5 = vpop.permute.xlu0 %965  ;;  %1153 = vst.msk [vmem:[%s2645_s3 + $0x128] sm:$0xff] %vm1115_vm2, %v998_v12  ;;  %v970_v45 = vpop.permute.xlu2 %969 }
 0x13d   :  { %1139 = vst.msk [vmem:[%s2645_s3 + $0xb8] sm:$0xff] %vm1115_vm2, %v970_v45 }
 0x13e   :  { %1137 = vst.msk [vmem:[%s2645_s3 + $0xa8] sm:$0xff] %vm1115_vm2, %v966_v5 }
 0x143   :  { %v968_v37 = vpop.permute.xlu1 %967  ;;  %1049 = vrot.lane.b32.xlu1 %v2332_v25, %s1595_s9 }
 0x144   :  { %v1030_v13 = vpop.permute.xlu0 %1029  ;;  %1138 = vst.msk [vmem:[%s2645_s3 + $0xb0] sm:$0xff] %vm1115_vm2, %v968_v37  ;;  %v1034_v14 = vpop.permute.xlu2 %1033 }
 0x145   :  { %1171 = vst.msk [vmem:[%s2645_s3 + $0x1b8] sm:$0xff] %vm1115_vm2, %v1034_v14 }
 0x146   :  { %1169 = vst.msk [vmem:[%s2645_s3 + $0x1a8] sm:$0xff] %vm1115_vm2, %v1030_v13 }
 0x14b   :  { %v1032_v15 = vpop.permute.xlu1 %1031 }
 0x14c   :  { %v936_v16 = vpop.permute.xlu0 %935  ;;  %1170 = vst.msk [vmem:[%s2645_s3 + $0x1b0] sm:$0xff] %vm1115_vm2, %v1032_v15  ;;  %v940_v25 = vpop.permute.xlu2 %939 }
 0x14d   :  { %1124 = vst.msk [vmem:[%s2645_s3 + $0x40] sm:$0xff] %vm1115_vm2, %v940_v25 }
 0x14e   :  { %1122 = vst.msk [vmem:[%s2645_s3 + $0x30] sm:$0xff] %vm1115_vm2, %v936_v16 }
 0x153   :  { %v938_v17 = vpop.permute.xlu1 %937 }
 0x154   :  { %v1002_v27 = vpop.permute.xlu0 %1001  ;;  %1123 = vst.msk [vmem:[%s2645_s3 + $0x38] sm:$0xff] %vm1115_vm2, %v938_v17  ;;  %v1006_v19 = vpop.permute.xlu2 %1005 }
 0x155   :  { %1157 = vst.msk [vmem:[%s2645_s3 + $0x148] sm:$0xff] %vm1115_vm2, %v1006_v19 }
 0x156   :  { %1155 = vst.msk [vmem:[%s2645_s3 + $0x138] sm:$0xff] %vm1115_vm2, %v1002_v27 }
 0x15b   :  { %v1004_v9 = vpop.permute.xlu1 %1003 }
 0x15c   :  { %v972_v21 = vpop.permute.xlu0 %971  ;;  %1156 = vst.msk [vmem:[%s2645_s3 + $0x140] sm:$0xff] %vm1115_vm2, %v1004_v9  ;;  %v976_v22 = vpop.permute.xlu2 %975 }
 0x15d   :  { %1142 = vst.msk [vmem:[%s2645_s3 + $0xd0] sm:$0xff] %vm1115_vm2, %v976_v22 }
 0x15e   :  { %1140 = vst.msk [vmem:[%s2645_s3 + $0xc0] sm:$0xff] %vm1115_vm2, %v972_v21 }
 0x163   :  { %v974_v48 = vpop.permute.xlu1 %973 }
 0x164   :  { %v1036_v24 = vpop.permute.xlu0 %1035  ;;  %1141 = vst.msk [vmem:[%s2645_s3 + $0xc8] sm:$0xff] %vm1115_vm2, %v974_v48  ;;  %v1040_v26 = vpop.permute.xlu2 %1039 }
 0x165   :  { %1174 = vst.msk [vmem:[%s2645_s3 + $0x1d0] sm:$0xff] %vm1115_vm2, %v1040_v26 }
 0x166   :  { %1172 = vst.msk [vmem:[%s2645_s3 + $0x1c0] sm:$0xff] %vm1115_vm2, %v1036_v24 }
 0x16b   :  { %v1038_v30 = vpop.permute.xlu1 %1037 }
 0x16c   :  { %v942_v47 = vpop.permute.xlu0 %941  ;;  %1173 = vst.msk [vmem:[%s2645_s3 + $0x1c8] sm:$0xff] %vm1115_vm2, %v1038_v30  ;;  %v946_v31 = vpop.permute.xlu2 %945 }
 0x16d   :  { %1127 = vst.msk [vmem:[%s2645_s3 + $0x58] sm:$0xff] %vm1115_vm2, %v946_v31 }
 0x16e   :  { %1125 = vst.msk [vmem:[%s2645_s3 + $0x48] sm:$0xff] %vm1115_vm2, %v942_v47 }
 0x173   :  { %v944_v32 = vpop.permute.xlu1 %943 }
 0x174   :  { %v1008_v33 = vpop.permute.xlu0 %1007  ;;  %1126 = vst.msk [vmem:[%s2645_s3 + $0x50] sm:$0xff] %vm1115_vm2, %v944_v32  ;;  %v1012_v62 = vpop.permute.xlu2 %1011 }
 0x175   :  { %1160 = vst.msk [vmem:[%s2645_s3 + $0x160] sm:$0xff] %vm1115_vm2, %v1012_v62 }
 0x176   :  { %1158 = vst.msk [vmem:[%s2645_s3 + $0x150] sm:$0xff] %vm1115_vm2, %v1008_v33 }
 0x17b   :  { %v1010_v34 = vpop.permute.xlu1 %1009 }
 0x17c   :  { %v978_v35 = vpop.permute.xlu0 %977  ;;  %1159 = vst.msk [vmem:[%s2645_s3 + $0x158] sm:$0xff] %vm1115_vm2, %v1010_v34  ;;  %v982_v36 = vpop.permute.xlu2 %981 }
 0x17d   :  { %1145 = vst.msk [vmem:[%s2645_s3 + $0xe8] sm:$0xff] %vm1115_vm2, %v982_v36 }
 0x17e   :  { %1143 = vst.msk [vmem:[%s2645_s3 + $0xd8] sm:$0xff] %vm1115_vm2, %v978_v35 }
 0x183   :  { %v980_v29 = vpop.permute.xlu1 %979 }
 0x184   :  { %v1042_v38 = vpop.permute.xlu0 %1041  ;;  %1144 = vst.msk [vmem:[%s2645_s3 + $0xe0] sm:$0xff] %vm1115_vm2, %v980_v29  ;;  %v952_v18 = vpop.permute.xlu2 %951 }
 0x185   :  { %1130 = vst.msk [vmem:[%s2645_s3 + $0x70] sm:$0xff] %vm1115_vm2, %v952_v18 }
 0x186   :  { %1175 = vst.msk [vmem:[%s2645_s3 + $0x1d8] sm:$0xff] %vm1115_vm2, %v1042_v38 }
 0x18b   :  { %v1044_v39 = vpop.permute.xlu1 %1043 }
 0x18c   :  { %v948_v40 = vpop.permute.xlu0 %947  ;;  %1176 = vst.msk [vmem:[%s2645_s3 + $0x1e0] sm:$0xff] %vm1115_vm2, %v1044_v39  ;;  %v1018_v41 = vpop.permute.xlu2 %1017 }
 0x18d   :  { %1163 = vst.msk [vmem:[%s2645_s3 + $0x178] sm:$0xff] %vm1115_vm2, %v1018_v41 }
 0x18e   :  { %1128 = vst.msk [vmem:[%s2645_s3 + $0x60] sm:$0xff] %vm1115_vm2, %v948_v40 }
 0x193   :  { %v950_v63 = vpop.permute.xlu1 %949 }
 0x194   :  { %v1014_v42 = vpop.permute.xlu0 %1013  ;;  %1129 = vst.msk [vmem:[%s2645_s3 + $0x68] sm:$0xff] %vm1115_vm2, %v950_v63  ;;  %v1046_v43 = vpop.permute.xlu2 %1045 }
 0x195   :  { %1177 = vst.msk [vmem:[%s2645_s3 + $0x1e8] sm:$0xff] %vm1115_vm2, %v1046_v43 }
 0x196   :  { %1161 = vst.msk [vmem:[%s2645_s3 + $0x168] sm:$0xff] %vm1115_vm2, %v1014_v42 }
 0x19b   :  { %v1016_v8 = vpop.permute.xlu1 %1015 }
 0x19c   :  { %v984_v44 = vpop.permute.xlu0 %983  ;;  %1162 = vst.msk [vmem:[%s2645_s3 + $0x170] sm:$0xff] %vm1115_vm2, %v1016_v8 }
 0x19d   :  { %1146 = vst.msk [vmem:[%s2645_s3 + $0xf0] sm:$0xff] %vm1115_vm2, %v984_v44 }
 0x1a3   :  { %v986_v0 = vpop.permute.xlu1 %985 }
 0x1a4   :  { %v954_v46 = vpop.permute.xlu0 %953  ;;  %1147 = vst.msk [vmem:[%s2645_s3 + $0xf8] sm:$0xff] %vm1115_vm2, %v986_v0 }
 0x1a5   :  { %1131 = vst.msk [vmem:[%s2645_s3 + $0x78] sm:$0xff] %vm1115_vm2, %v954_v46 }
 0x1ac   :  { %v1048_v49 = vpop.permute.xlu0 %1047 }
 0x1ad   :  { %1178 = vst.msk [vmem:[%s2645_s3 + $0x1f0] sm:$0xff] %vm1115_vm2, %v1048_v49  ;;  %v1316_v50 = vpop.permute.xlu1 %1315 }
 0x1ae   :  { %1318 = vst.msk [vmem:[#allocation2] sm:$0xff] %vm1115_vm2, %v1316_v50 }
 0x1af   :  { %1333 = dma.vmem_to_hbm [thread:$0]  %s1329_s8, 128, %s1331_s12, [#allocation3]  }
 0x1b5   :  { %v1050_v23 = vpop.permute.xlu1 %1049 }
 0x1b6   :  { %1179 = vst.msk [vmem:[%s2645_s3 + $0x1f8] sm:$0xff] %vm1115_vm2, %v1050_v23 }
 0x1b7   :  { %1593 = dma.done.wait [#allocation3], 128  }
 0x1b8   :  { %1594 = vsyncadd [#allocation3], 4294967168 }
 0x1b9   :  { %1342 = vsyncpa [#allocation3], 1 }

</bundles_post_ra>
